<compile_context>
chip_gen: v7x
topology: tpu7x:2x2x1
jax: 0.10.0
libtpu: 0.0.40
codegen_flags: <defaults>
</compile_context>

<pallas_src>
import functools

import jax
import jax.numpy as jnp
from jax.experimental import pallas as pl
from jax.experimental.pallas import tpu as pltpu


# ------------------------- generation-aware config --------------------------

def _device_kind():
    try:
        return jax.devices()[0].device_kind.lower()
    except Exception:
        return ""


_KIND = _device_kind()
_IS_V5E = ("v5 lite" in _KIND) or ("v5e" in _KIND) or ("v5litepod" in _KIND)
_IS_V7 = "v7" in _KIND


def _vmem_capacity_bytes():
    try:
        return int(pltpu.get_tpu_info().vmem_capacity_bytes)
    except Exception:
        # v7x has 64 MiB per TensorCore; v5e/v6e have 128 MiB.
        return (64 if _IS_V7 else 128) * 1024 * 1024


_VMEM_CAP = _vmem_capacity_bytes()
_VMEM_LIMIT = min(int(0.75 * _VMEM_CAP), 112 * 1024 * 1024)   # 48 MiB on v7x, 96 MiB on v5e/v6e
_TMN = 128 if _IS_V5E else 256          # M/N tile target (MXU width)
_TK = 512 if _IS_V7 else 1024           # K tile target (deeper streaming where VMEM allows)
_ATTN_T = 128 if _IS_V5E else 256       # flash-attention q/kv tile target


def _pick(dim, target, align):
    """Largest `align`-aligned divisor of dim that is <= target; else the full dim."""
    if dim <= target:
        return dim
    t = (min(target, dim) // align) * align
    while t >= align:
        if dim % t == 0:
            return t
        t -= align
    # TODO(synk): non-divisible dims (e.g. vision S=197 at real CLIP sizes) fall back
    # to the full extent; switch to a pl.cdiv grid + edge masking before scaling up.
    return dim


def _cparams(dimension_semantics):
    return pltpu.CompilerParams(dimension_semantics=dimension_semantics,
                                vmem_limit_bytes=_VMEM_LIMIT)


def _full_spec(shape):
    n = len(shape)
    return pl.BlockSpec(shape, lambda *_: (0,) * n)


def _gelu(y):
    # TODO(synk): tanh-approx GELU; swap for exact-erf (nn.GELU default) or
    # quick_gelu if bit-matching a specific reference is required.
    return 0.5 * y * (1.0 + jnp.tanh(0.7978845608028654 * (y + 0.044715 * y * y * y)))


# ----------------------------- Pallas kernels ------------------------------

def _matmul_kernel(x_ref, w_ref, b_ref, *rest, activation, has_residual):
    """Tiled matmul; accumulates into the resident f32 output block across k."""
    if has_residual:
        res_ref, o_ref = rest
    else:
        res_ref = None
        (o_ref,) = rest
    k = pl.program_id(2)

    @pl.when(k == 0)
    def _():
        o_ref[...] = jnp.zeros_like(o_ref)

    o_ref[...] += jnp.dot(x_ref[...], w_ref[...], preferred_element_type=jnp.float32)

    @pl.when(k == pl.num_programs(2) - 1)
    def _():
        y = o_ref[...] + b_ref[...]
        if activation == "gelu":
            y = _gelu(y)
        if has_residual:
            y = y + res_ref[...]
        o_ref[...] = y.astype(o_ref.dtype)


def linear(x, w, b, residual=None, activation=None):
    """y = act(x @ w + b) (+ residual). x, w bf16 on the MXU; output/residual f32."""
    if x.dtype != jnp.bfloat16:
        x = x.astype(jnp.bfloat16)
    if w.dtype != jnp.bfloat16:
        w = w.astype(jnp.bfloat16)
    M, K = x.shape
    N = w.shape[1]
    tm, tn, tk = _pick(M, _TMN, 8), _pick(N, _TMN, 128), _pick(K, _TK, 128)
    grid = (M // tm, N // tn, K // tk)

    in_specs = [pl.BlockSpec((tm, tk), lambda i, j, k: (i, k)),
                pl.BlockSpec((tk, tn), lambda i, j, k: (k, j)),
                pl.BlockSpec((1, tn), lambda i, j, k: (0, j))]
    args = [x, w, b.reshape(1, N)]
    if residual is not None:
        in_specs.append(pl.BlockSpec((tm, tn), lambda i, j, k: (i, j)))
        args.append(residual)

    return pl.pallas_call(
        functools.partial(_matmul_kernel, activation=activation,
                          has_residual=residual is not None),
        out_shape=jax.ShapeDtypeStruct((M, N), jnp.float32),
        grid=grid,
        in_specs=in_specs,
        out_specs=pl.BlockSpec((tm, tn), lambda i, j, k: (i, j)),
        compiler_params=_cparams(("parallel", "parallel", "arbitrary")),
        cost_estimate=pl.CostEstimate(
            flops=2 * M * N * K,
            transcendentals=(M * N if activation == "gelu" else 0),
            bytes_accessed=2 * M * K + 2 * K * N
            + 4 * M * N * (2 if residual is not None else 1) + 4 * N),
    )(*args)


def _ln_matmul_kernel(x_ref, g_ref, bln_ref, w_ref, b_ref, o_ref, h_sc, *,
                      eps, activation):
    """Fused LayerNorm -> matmul -> bias (-> GELU).

    The normalized (and bf16-cast) M-tile is computed once at the first N-tile
    and cached in VMEM scratch; j axis is 'arbitrary' so the cache stays valid.
    """
    @pl.when(pl.program_id(1) == 0)
    def _():
        x = x_ref[...]
        mu = jnp.mean(x, axis=-1, keepdims=True)
        var = jnp.mean((x - mu) ** 2, axis=-1, keepdims=True)
        h = (x - mu) * jax.lax.rsqrt(var + eps) * g_ref[...] + bln_ref[...]
        h_sc[...] = h.astype(jnp.bfloat16)

    y = jnp.dot(h_sc[...], w_ref[...], preferred_element_type=jnp.float32) + b_ref[...]
    if activation == "gelu":
        y = _gelu(y)
    o_ref[...] = y.astype(o_ref.dtype)


def ln_linear(x, ln_g, ln_b, w, b, activation=None, eps=1e-5, out_dtype=jnp.float32):
    if w.dtype != jnp.bfloat16:
        w = w.astype(jnp.bfloat16)
    M, K = x.shape
    N = w.shape[1]
    tm, tn = _pick(M, _TMN, 8), _pick(N, _TMN, 128)
    grid = (M // tm, N // tn)
    return pl.pallas_call(
        functools.partial(_ln_matmul_kernel, eps=eps, activation=activation),
        out_shape=jax.ShapeDtypeStruct((M, N), out_dtype),
        grid=grid,
        in_specs=[pl.BlockSpec((tm, K), lambda i, j: (i, 0)),
                  pl.BlockSpec((1, K), lambda i, j: (0, 0)),
                  pl.BlockSpec((1, K), lambda i, j: (0, 0)),
                  pl.BlockSpec((K, tn), lambda i, j: (0, j)),
                  pl.BlockSpec((1, tn), lambda i, j: (0, j))],
        out_specs=pl.BlockSpec((tm, tn), lambda i, j: (i, j)),
        scratch_shapes=[pltpu.VMEM((tm, K), jnp.bfloat16)],
        compiler_params=_cparams(("parallel", "arbitrary")),
        cost_estimate=pl.CostEstimate(
            flops=2 * M * N * K + 10 * M * K,
            transcendentals=M + (M * N if activation == "gelu" else 0),
            bytes_accessed=4 * M * K + 2 * K * N
            + M * N * jnp.dtype(out_dtype).itemsize + 8 * K + 4 * N),
    )(x, ln_g.reshape(1, K), ln_b.reshape(1, K), w, b.reshape(1, N))


def _layernorm_kernel(x_ref, g_ref, b_ref, o_ref, *, eps):
    x = x_ref[...]
    mu = jnp.mean(x, axis=-1, keepdims=True)
    var = jnp.mean((x - mu) ** 2, axis=-1, keepdims=True)
    y = (x - mu) * jax.lax.rsqrt(var + eps)
    o_ref[...] = (y * g_ref[...] + b_ref[...]).astype(o_ref.dtype)


def layernorm(x, g, b, eps=1e-5):
    M, D = x.shape
    tm = _pick(M, _TMN, 8)
    return pl.pallas_call(
        functools.partial(_layernorm_kernel, eps=eps),
        out_shape=jax.ShapeDtypeStruct((M, D), jnp.float32),
        grid=(M // tm,),
        in_specs=[pl.BlockSpec((tm, D), lambda i: (i, 0)),
                  pl.BlockSpec((1, D), lambda i: (0, 0)),
                  pl.BlockSpec((1, D), lambda i: (0, 0))],
        out_specs=pl.BlockSpec((tm, D), lambda i: (i, 0)),
        compiler_params=_cparams(("parallel",)),
        cost_estimate=pl.CostEstimate(flops=10 * M * D, transcendentals=M,
                                      bytes_accessed=8 * M * D + 8 * D),
    )(x, g.reshape(1, D), b.reshape(1, D))


def _flash_attn_kernel(q_ref, k_ref, v_ref, *rest, has_bias):
    """Flash-style attention with online softmax over the kv grid axis.

    The 1/sqrt(Dh) scale is pre-folded into the Q projection weights.
    """
    if has_bias:
        bias_ref, o_ref, m_sc, l_sc, acc_sc = rest
    else:
        bias_ref = None
        o_ref, m_sc, l_sc, acc_sc = rest
    kv = pl.program_id(2)

    @pl.when(kv == 0)
    def _():
        m_sc[...] = jnp.full_like(m_sc, -jnp.inf)
        l_sc[...] = jnp.zeros_like(l_sc)
        acc_sc[...] = jnp.zeros_like(acc_sc)

    q = q_ref[0]                                   # (tq, Dh) bf16
    k = k_ref[0]                                   # (tkv, Dh) bf16
    s = jax.lax.dot_general(q, k, (((1,), (1,)), ((), ())),
                            preferred_element_type=jnp.float32)   # (tq, tkv) f32
    if has_bias:
        s = s + bias_ref[0]                        # (1, tkv) broadcast over queries

    m_prev = m_sc[...]
    m_new = jnp.maximum(m_prev, jnp.max(s, axis=-1, keepdims=True))
    alpha = jnp.exp(m_prev - m_new)
    p = jnp.exp(s - m_new)
    l_sc[...] = alpha * l_sc[...] + jnp.sum(p, axis=-1, keepdims=True)
    acc_sc[...] = alpha * acc_sc[...] + jnp.dot(
        p.astype(jnp.bfloat16), v_ref[0], preferred_element_type=jnp.float32)
    m_sc[...] = m_new

    @pl.when(kv == pl.num_programs(2) - 1)
    def _():
        o_ref[0] = (acc_sc[...] *
                    pl.reciprocal(l_sc[...], approx=True)).astype(o_ref.dtype)


def flash_attention(q, k, v, bias, num_heads):
    """q,k,v: [G=B*H, S, Dh] bf16.  bias: [B, 1, S] f32 or None.  Returns bf16 [G,S,Dh]."""
    G, S, Dh = q.shape
    tq = _pick(S, _ATTN_T, 8)
    tkv = _pick(S, _ATTN_T, 128)
    grid = (G, S // tq, S // tkv)

    in_specs = [pl.BlockSpec((1, tq, Dh), lambda g, qi, kv: (g, qi, 0)),
                pl.BlockSpec((1, tkv, Dh), lambda g, qi, kv: (g, kv, 0)),
                pl.BlockSpec((1, tkv, Dh), lambda g, qi, kv: (g, kv, 0))]
    args = [q, k, v]
    if bias is not None:
        in_specs.append(
            pl.BlockSpec((1, 1, tkv), lambda g, qi, kv: (g // num_heads, 0, kv)))
        args.append(bias)

    return pl.pallas_call(
        functools.partial(_flash_attn_kernel, has_bias=bias is not None),
        out_shape=jax.ShapeDtypeStruct((G, S, Dh), jnp.bfloat16),
        grid=grid,
        in_specs=in_specs,
        out_specs=pl.BlockSpec((1, tq, Dh), lambda g, qi, kv: (g, qi, 0)),
        scratch_shapes=[pltpu.VMEM((tq, 1), jnp.float32),
                        pltpu.VMEM((tq, 1), jnp.float32),
                        pltpu.VMEM((tq, Dh), jnp.float32)],
        compiler_params=_cparams(("parallel", "parallel", "arbitrary")),
        cost_estimate=pl.CostEstimate(
            flops=4 * G * S * S * Dh, transcendentals=2 * G * S * S,
            bytes_accessed=8 * G * S * Dh),
    )(*args)


def _clip_head_kernel(img_ref, txt_ref, ls_ref, logits_ref, li2t_ref, lt2i_ref):
    img = img_ref[...]
    txt = txt_ref[...]
    scale = ls_ref[0, 0]                            # exp(logit_scale), from SMEM
    # F.normalize(x, dim=-1): x / max(||x||_2, 1e-12)
    img_n = img / jnp.maximum(jnp.sqrt(jnp.sum(img * img, axis=-1, keepdims=True)), 1e-12)
    txt_n = txt / jnp.maximum(jnp.sqrt(jnp.sum(txt * txt, axis=-1, keepdims=True)), 1e-12)
    logits = scale * jax.lax.dot_general(
        img_n, txt_n, (((1,), (1,)), ((), ())), preferred_element_type=jnp.float32)
    logits_ref[...] = logits

    B = logits.shape[0]
    r = jax.lax.broadcasted_iota(jnp.int32, (B, B), 0)
    c = jax.lax.broadcasted_iota(jnp.int32, (B, B), 1)
    eye = (r == c).astype(jnp.float32)

    # image -> text cross entropy (per row, labels = diagonal)
    m1 = jnp.max(logits, axis=-1, keepdims=True)
    lse1 = m1 + jnp.log(jnp.sum(jnp.exp(logits - m1), axis=-1, keepdims=True))   # (B,1)
    diag1 = jnp.sum(logits * eye, axis=-1, keepdims=True)                        # (B,1)
    li2t_ref[...] = jnp.mean(lse1 - diag1, axis=0, keepdims=True)                # (1,1)

    # text -> image cross entropy (rows of logits.T == columns of logits)
    m0 = jnp.max(logits, axis=0, keepdims=True)
    lse0 = m0 + jnp.log(jnp.sum(jnp.exp(logits - m0), axis=0, keepdims=True))    # (1,B)
    diag0 = jnp.sum(logits * eye, axis=0, keepdims=True)                         # (1,B)
    lt2i_ref[...] = jnp.mean(lse0 - diag0, axis=1, keepdims=True)                # (1,1)


def clip_head(image_features, text_features, logit_scale_exp):
    # TODO(synk): single full-array block; tile over B x B before scaling batch size.
    B, D = image_features.shape
    return pl.pallas_call(
        _clip_head_kernel,
        out_shape=(jax.ShapeDtypeStruct((B, B), jnp.float32),
                   jax.ShapeDtypeStruct((1, 1), jnp.float32),
                   jax.ShapeDtypeStruct((1, 1), jnp.float32)),
        grid=(1,),
        in_specs=[_full_spec((B, D)), _full_spec((B, D)),
                  pl.BlockSpec(memory_space=pltpu.MemorySpace.SMEM)],
        out_specs=(_full_spec((B, B)), _full_spec((1, 1)), _full_spec((1, 1))),
        compiler_params=_cparams(("arbitrary",)),
    )(image_features, text_features, logit_scale_exp.reshape(1, 1))


# ------------------------------ model glue ---------------------------------

def make_attn_bias(attention_mask):
    if attention_mask is None:
        return None                                          # skip zero-bias DMA
    neg = (1.0 - attention_mask.astype(jnp.float32)) * -1e9  # (B, S)
    return neg[:, None, :]                                   # (B, 1, S), per-head via index_map


def transformer_block(x, bias, p, num_heads):
    B, S, D = x.shape
    Dh = D // num_heads
    x2 = x.reshape(B * S, D)

    # LN1 fused into the QKV projection (bf16 output, 1/sqrt(Dh) pre-folded into Wq).
    qkv = ln_linear(x2, p["ln1_g"], p["ln1_b"], p["wqkv"], p["bqkv"],
                    out_dtype=jnp.bfloat16)
    qkv = qkv.reshape(B, S, 3, num_heads, Dh)
    # TODO(synk): head split/merge stays XLA transpose glue (bf16, half the traffic);
    # folding it into flash-attention BlockSpecs needs Dh to be a 128-lane multiple.
    q = qkv[:, :, 0].transpose(0, 2, 1, 3).reshape(B * num_heads, S, Dh)
    k = qkv[:, :, 1].transpose(0, 2, 1, 3).reshape(B * num_heads, S, Dh)
    v = qkv[:, :, 2].transpose(0, 2, 1, 3).reshape(B * num_heads, S, Dh)

    a = flash_attention(q, k, v, bias, num_heads)            # bf16 (G, S, Dh)
    a = a.reshape(B, num_heads, S, Dh).transpose(0, 2, 1, 3).reshape(B * S, D)

    # Out-projection with the residual add fused in.
    x2 = linear(a, p["wo"], p["bo"], residual=x2)

    # LN2 fused into the MLP up-projection (GELU, bf16 out); residual fused into down-proj.
    h = ln_linear(x2, p["ln2_g"], p["ln2_b"], p["w1"], p["b1"],
                  activation="gelu", out_dtype=jnp.bfloat16)
    x2 = linear(h, p["w2"], p["b2"], residual=x2)
    return x2.reshape(B, S, D)


def encode_image(vp, images, cfg):
    B, C, H, W = images.shape
    pz = cfg["patch_size"]
    D = cfg["embed_dim"]
    nH, nW = H // pz, W // pz
    N = nH * nW
    patches = images.reshape(B, C, nH, pz, nW, pz).transpose(0, 2, 4, 1, 3, 5)
    patches = patches.reshape(B * N, C * pz * pz)
    x = linear(patches.astype(jnp.bfloat16), vp["patch_w"], vp["patch_b"]).reshape(B, N, D)
    cls = jnp.broadcast_to(vp["cls"], (B, 1, D))
    x = jnp.concatenate([cls, x], axis=1) + vp["pos"]
    for blk in vp["blocks"]:
        x = transformer_block(x, None, blk, cfg["vit_num_heads"])   # no mask in ViT
    # LN is per-token, so LN(final)[cls] == LN(cls): fuse the final LN into the projection.
    return ln_linear(x[:, 0], vp["ln_f_g"], vp["ln_f_b"], vp["proj_w"], vp["proj_b"])


def encode_text(tp, input_ids, attention_mask, cfg):
    B, S = input_ids.shape
    D = cfg["embed_dim"]
    x = jnp.take(tp["tok_emb"], input_ids, axis=0) + tp["pos_emb"][None, :S, :]
    bias = make_attn_bias(attention_mask)
    for blk in tp["blocks"]:
        x = transformer_block(x, bias, blk, cfg["text_heads"])
    x = layernorm(x.reshape(B * S, D), tp["ln_f_g"], tp["ln_f_b"]).reshape(B, S, D)
    # TODO(synk): masked mean pooling (HF CLIP pools the EOS hidden state instead).
    if attention_mask is None:
        pooled = jnp.mean(x, axis=1)
    else:
        m = attention_mask.astype(jnp.float32)[:, :, None]
        pooled = jnp.sum(x * m, axis=1) / jnp.maximum(jnp.sum(m, axis=1), 1.0)
    return linear(pooled.astype(jnp.bfloat16), tp["proj_w"], tp["proj_b"])   # [B, embed_dim]


def clip_forward(params, images, input_ids, attention_mask=None, return_loss=True):
    cfg = params["config"]
    image_features = encode_image(params["vision"], images, cfg)
    text_features = encode_text(params["text"], input_ids, attention_mask, cfg)
    logit_scale_exp = jnp.exp(params["logit_scale"])
    logits_per_image, li2t, lt2i = clip_head(image_features, text_features, logit_scale_exp)
    out = {
        "image_features": image_features,
        "text_features": text_features,
        "logit_scale": logit_scale_exp,
        "logits_per_image": logits_per_image,
        "logits_per_text": logits_per_image.T,
    }
    if return_loss:
        loss_i2t = li2t[0, 0]
        loss_t2i = lt2i[0, 0]
        out.update({
            "loss": (loss_i2t + loss_t2i) / 2.0,
            "image2text_loss": loss_i2t,
            "text2image_loss": loss_t2i,
        })
    return out


# ------------------------ deterministic parameter init ---------------------

def init_params(cfg, key):
    keys = iter(jax.random.split(key, 256))

    def nrm(shape, s=0.02):
        return (s * jax.random.normal(next(keys), shape)).astype(jnp.float32)

    def bf16_w(shape, s=0.02):
        # Weights are stored in bf16 once, at init (no per-forward casts).
        return nrm(shape, s).astype(jnp.bfloat16)

    def zeros(shape):
        return jnp.zeros(shape, jnp.float32)

    def ones(shape):
        return jnp.ones(shape, jnp.float32)

    D = cfg["embed_dim"]

    def block(num_heads, mlp_ratio):
        # Fold the attention softmax scale 1/sqrt(Dh) into the Q projection columns.
        scale = 1.0 / float(D // num_heads) ** 0.5
        wqkv = nrm((D, 3 * D)).at[:, :D].multiply(scale)
        bqkv = zeros((3 * D,)).at[:D].multiply(scale)
        return {
            "ln1_g": ones((D,)), "ln1_b": zeros((D,)),
            "wqkv": wqkv.astype(jnp.bfloat16), "bqkv": bqkv,
            "wo": bf16_w((D, D)), "bo": zeros((D,)),
            "ln2_g": ones((D,)), "ln2_b": zeros((D,)),
            "w1": bf16_w((D, mlp_ratio * D)), "b1": zeros((mlp_ratio * D,)),
            "w2": bf16_w((mlp_ratio * D, D)), "b2": zeros((D,)),
        }

    pz = cfg["patch_size"]
    N = (cfg["image_size"] // pz) ** 2
    vision = {
        "patch_w": bf16_w((3 * pz * pz, D)), "patch_b": zeros((D,)),
        "cls": nrm((1, 1, D)), "pos": nrm((1, N + 1, D)),
        "blocks": [block(cfg["vit_num_heads"], cfg["vit_mlp_ratio"])
                   for _ in range(cfg["vit_depth"])],
        "ln_f_g": ones((D,)), "ln_f_b": zeros((D,)),
        "proj_w": bf16_w((D, D)), "proj_b": zeros((D,)),
    }
    text = {
        "tok_emb": nrm((cfg["vocab_size"], D)),
        "pos_emb": nrm((cfg["max_text_length"], D)),
        "blocks": [block(cfg["text_heads"], cfg["vit_mlp_ratio"])
                   for _ in range(cfg["text_layers"])],
        "ln_f_g": ones((D,)), "ln_f_b": zeros((D,)),
        "proj_w": bf16_w((D, D)), "proj_b": zeros((D,)),
    }
    return {
        "config": cfg,
        "vision": vision,
        "text": text,
        "logit_scale": jnp.log(jnp.float32(1.0 / cfg["temperature"])),
    }


# ----------------------------------- main -----------------------------------

if __name__ == "__main__":
    cfg = dict(
        vision_encoder="vit",
        embed_dim=32,
        image_size=16,
        patch_size=8,
        vit_depth=2,
        vit_num_heads=4,
        vit_mlp_ratio=4,
        vocab_size=64,
        max_text_length=8,
        text_heads=4,
        text_layers=2,
        temperature=0.07,
        dropout=0.0,  # TODO(synk): dropout is a no-op here (inference semantics)
    )

    key = jax.random.PRNGKey(0)
    k_param, k_img, k_txt = jax.random.split(key, 3)
    params = init_params(cfg, k_param)

    B = 2
    images = jax.random.normal(k_img, (B, 3, cfg["image_size"], cfg["image_size"]),
                               dtype=jnp.float32)
    input_ids = jax.random.randint(k_txt, (B, cfg["max_text_length"]), 0, cfg["vocab_size"])
    attention_mask = jnp.array([[1, 1, 1, 1, 1, 1, 1, 1],
                                [1, 1, 1, 1, 1, 0, 0, 0]], dtype=jnp.int32)

    out = clip_forward(params, images, input_ids, attention_mask, return_loss=True)
    jax.block_until_ready(out["loss"])
    jax.block_until_ready(out["logits_per_image"])
    print("KERNEL_OK")
</pallas_src>

<mosaic_0001>
module attributes {stable_mosaic.version = 11 : i64} {
  func.func @_matmul_kernel(%arg0: i32, %arg1: i32, %arg2: i32, %arg3: memref<8x192xbf16, #tpu.memory_space<vmem>>, %arg4: memref<192x32xbf16, #tpu.memory_space<vmem>>, %arg5: memref<1x32xf32, #tpu.memory_space<vmem>>, %arg6: memref<8x32xf32, #tpu.memory_space<vmem>>) attributes {dimension_semantics = [#tpu.dimension_semantics<parallel>, #tpu.dimension_semantics<parallel>, #tpu.dimension_semantics<arbitrary>], iteration_bounds = array<i64: 1, 1, 1>, scalar_prefetch = 0 : i64, scratch_operands = 0 : i64, tpu.core_type = #tpu.core_type<tc>, window_params = [{transform_indices = @transform_0, window_bounds = array<i64: 8, 192>}, {transform_indices = @transform_1, window_bounds = array<i64: 192, 32>}, {transform_indices = @transform_2, window_bounds = array<i64: 1, 32>}, {transform_indices = @transform_3, window_bounds = array<i64: 8, 32>}]} {
    %c0_i32 = arith.constant 0 : i32
    %0 = arith.cmpi eq, %arg2, %c0_i32 : i32
    %1 = arith.extui %0 : i1 to i32
    %c0_i32_0 = arith.constant 0 : i32
    %2 = arith.cmpi ne, %1, %c0_i32_0 : i32
    scf.if %2 {
      %cst_10 = arith.constant 0.000000e+00 : f32
      %12 = vector.broadcast %cst_10 : f32 to vector<8x32xf32>
      %c0_11 = arith.constant 0 : index
      %c0_12 = arith.constant 0 : index
      %13 = vector.load %arg6[%c0_11, %c0_12] : memref<8x32xf32, #tpu.memory_space<vmem>>, vector<8x32xf32>
      tpu.vector_store %arg6[%c0_11, %c0_12], %12 {strides = array<i32>} : memref<8x32xf32, #tpu.memory_space<vmem>>, vector<8x32xf32>,
    } else {
    }
    %c0 = arith.constant 0 : index
    %c0_1 = arith.constant 0 : index
    %3 = vector.load %arg6[%c0, %c0_1] : memref<8x32xf32, #tpu.memory_space<vmem>>, vector<8x32xf32>
    %c0_2 = arith.constant 0 : index
    %c0_3 = arith.constant 0 : index
    %4 = vector.load %arg3[%c0_2, %c0_3] : memref<8x192xbf16, #tpu.memory_space<vmem>>, vector<8x192xbf16>
    %c0_4 = arith.constant 0 : index
    %c0_5 = arith.constant 0 : index
    %5 = vector.load %arg4[%c0_4, %c0_5] : memref<192x32xbf16, #tpu.memory_space<vmem>>, vector<192x32xbf16>
    %cst = arith.constant dense<0.000000e+00> : vector<8x32xf32>
    %6 = tpu.matmul %4, %5, %cst {dimension_numbers = #tpu.dot_dimension_numbers<[1], [0], [0], [1], [0, 0, 1, 1], [], []>} : vector<8x192xbf16>, vector<192x32xbf16>, vector<8x32xf32> -> vector<8x32xf32>
    %7 = arith.addf %3, %6 : vector<8x32xf32>
    %c0_6 = arith.constant 0 : index
    %c0_7 = arith.constant 0 : index
    %8 = vector.load %arg6[%c0_6, %c0_7] : memref<8x32xf32, #tpu.memory_space<vmem>>, vector<8x32xf32>
    tpu.vector_store %arg6[%c0_6, %c0_7], %7 {strides = array<i32>} : memref<8x32xf32, #tpu.memory_space<vmem>>, vector<8x32xf32>,
    %c0_i32_8 = arith.constant 0 : i32
    %9 = arith.cmpi eq, %arg2, %c0_i32_8 : i32
    %10 = arith.extui %9 : i1 to i32
    %c0_i32_9 = arith.constant 0 : i32
    %11 = arith.cmpi ne, %10, %c0_i32_9 : i32
    scf.if %11 {
      %c0_10 = arith.constant 0 : index
      %c0_11 = arith.constant 0 : index
      %12 = vector.load %arg6[%c0_10, %c0_11] : memref<8x32xf32, #tpu.memory_space<vmem>>, vector<8x32xf32>
      %c0_12 = arith.constant 0 : index
      %c0_13 = arith.constant 0 : index
      %13 = vector.load %arg5[%c0_12, %c0_13] : memref<1x32xf32, #tpu.memory_space<vmem>>, vector<1x32xf32>
      %14 = vector.broadcast %13 : vector<1x32xf32> to vector<8x32xf32>
      %15 = arith.addf %12, %14 : vector<8x32xf32>
      %c0_14 = arith.constant 0 : index
      %c0_15 = arith.constant 0 : index
      %16 = vector.load %arg6[%c0_14, %c0_15] : memref<8x32xf32, #tpu.memory_space<vmem>>, vector<8x32xf32>
      tpu.vector_store %arg6[%c0_14, %c0_15], %15 {strides = array<i32>} : memref<8x32xf32, #tpu.memory_space<vmem>>, vector<8x32xf32>,
    } else {
    }
    return
  }
  func.func @transform_0(%arg0: i32, %arg1: i32, %arg2: i32) -> (i32, i32) {
    %c0_i32 = arith.constant 0 : i32
    return %arg0, %arg2 : i32, i32
  }
  func.func @transform_1(%arg0: i32, %arg1: i32, %arg2: i32) -> (i32, i32) {
    %c0_i32 = arith.constant 0 : i32
    return %arg2, %arg1 : i32, i32
  }
  func.func @transform_2(%arg0: i32, %arg1: i32, %arg2: i32) -> (i32, i32) {
    %c0_i32 = arith.constant 0 : i32
    %c0_i32_0 = arith.constant 0 : i32
    return %c0_i32, %arg1 : i32, i32
  }
  func.func @transform_3(%arg0: i32, %arg1: i32, %arg2: i32) -> (i32, i32) {
    %c0_i32 = arith.constant 0 : i32
    return %arg0, %arg1 : i32, i32
  }
}

</mosaic_0001>

<bundles_post_ra>
// kernel: tpu_custom_call.1
= control target key start
LH: loop header
LB: loop body
LE: loop exit
PB: predicated region body
PF: predicated region fallthrough
CT: control target
= control target key end

     0   :  { %8 = vsyncpa [#allocation3], 0  ;;  %s450_s0 = inlined_call_operand.hbm [shape: bf16[8,192], index: 0, kind: input, shape index: {}]   ;;  %s451_s1 = inlined_call_operand.hbm [shape: bf16[192,32], index: 1, kind: input, shape index: {}]   ;;  %s452_s2 = inlined_call_operand.hbm [shape: f32[1,32], index: 2, kind: input, shape index: {}]   ;;  %s453_s3 = inlined_call_operand.hbm [shape: f32[8,32], index: 3, kind: output, shape index: {}]  }
   0x1   :  { %9 = vsyncpa [#allocation6], 0 }
   0x2   :  { %10 = vsyncpa [#allocation4], 0  ;;  %s371_s12 = smov [#allocation5]   ;;  %s277_s16 = scalar_lea.hbm %s451_s1, 1536 }
   0x3   :  { %s26_s13 = sshll.u32 %s371_s12, 4  ;;  %p278_p0 = scmp.ne.s32.totalorder %s451_s1, %s277_s16  ;;  %s27_s13 = int_to_ptr.vmem [resolvable:$true] %s26_s13 }
   0x4   :  { %p281_p1 = scmp.lt.u32.totalorder %s277_s16, %s451_s1 }
   0x6   :  { %p283_p2 = pnand %p281_p1, %p278_p0 }
   0x8   :  { %286 = shalt.err (!%p283_p2)
}
   0x9   :  { %s287_s21 = scalar_lea.vmem %s27_s13, 1536  ;;  %p292_p4 = scmp.lt.s32.totalorder %s27_s13, %s27_s13 }
   0xa   :  { %p288_p3 = scmp.ne.s32.totalorder %s27_s13, %s287_s21  ;;  %p293_p5 = scmp.lt.s32.totalorder %s287_s21, %s287_s21 }
   0xc   :  { %p294_p6 = por %p293_p5, %p292_p4 }
   0xe   :  { %p295_p7 = pnand %p294_p6, %p288_p3 }
  0x10   :  { %298 = shalt.err (!%p295_p7)
}
  0x11   :  { %s372_s22 = smov 64   ;;  %s373_s23 = smov 4  }
  0x12   :  { %32 = dma.hbm_to_vmem [thread:$0]  %s451_s1, 1536, %s27_s13, [#allocation6], %s372_s22, %s372_s22, %s373_s23  }
  0x13   :  { %s374_s26 = smov [#allocation2]   ;;  %s375_s28 = smov [#allocation7]  }
  0x14   :  { %s17_s27 = sshll.u32 %s374_s26, 4  ;;  %s39_s29 = sshll.u32 %s375_s28, 4  ;;  %s18_s27 = int_to_ptr.vmem [resolvable:$true] %s17_s27  ;;  %s40_s29 = int_to_ptr.vmem [resolvable:$true] %s39_s29 }
  0x15   :  { %s299_s5 = scalar_lea.hbm %s450_s0, 128 }
  0x16   :  { %p300_p8 = scmp.ne.s32.totalorder %s450_s0, %s299_s5  ;;  %p303_p9 = scmp.lt.u32.totalorder %s299_s5, %s450_s0 }
  0x18   :  { %p305_p10 = pnand %p303_p9, %p300_p8 }
  0x1a   :  { %308 = shalt.err (!%p305_p10)
}
  0x1b   :  { %s309_s1 = scalar_lea.vmem %s18_s27, 128  ;;  %p314_p12 = scmp.lt.s32.totalorder %s18_s27, %s18_s27 }
  0x1c   :  { %p310_p11 = scmp.ne.s32.totalorder %s18_s27, %s309_s1  ;;  %p315_p13 = scmp.lt.s32.totalorder %s309_s1, %s309_s1 }
  0x1e   :  { %p316_p0 = por %p315_p13, %p314_p12 }
  0x20   :  { %p317_p1 = pnand %p316_p0, %p310_p11 }
  0x22   :  { %320 = shalt.err (!%p317_p1)
}
  0x23   :  { %20 = dma.hbm_to_vmem [thread:$0]  %s450_s0, 128, %s18_s27, [#allocation3]  }
  0x24   :  { %s321_s14 = scalar_lea.hbm %s452_s2, 16 }
  0x25   :  { %p322_p2 = scmp.ne.s32.totalorder %s452_s2, %s321_s14  ;;  %p325_p3 = scmp.lt.u32.totalorder %s321_s14, %s452_s2 }
  0x27   :  { %p327_p4 = pnand %p325_p3, %p322_p2 }
  0x29   :  { %330 = shalt.err (!%p327_p4)
}
  0x2a   :  { %s331_s19 = scalar_lea.vmem %s40_s29, 16  ;;  %s335_s20 = scalar_lea.vmem %s40_s29, 32 }
  0x2b   :  { %p332_p5 = scmp.ne.s32.totalorder %s40_s29, %s331_s19  ;;  %p336_p6 = scmp.lt.s32.totalorder %s40_s29, %s40_s29 }
  0x2c   :  { %p337_p7 = scmp.lt.s32.totalorder %s335_s20, %s331_s19 }
  0x2e   :  { %p338_p8 = por %p337_p7, %p336_p6 }
  0x30   :  { %p339_p9 = pnand %p338_p8, %p332_p5 }
  0x32   :  { %342 = shalt.err (!%p339_p9)
}
  0x33   :  { %42 = dma.hbm_to_vmem [thread:$0]  %s452_s2, 16, %s40_s29, [#allocation6]  }
  0x34   :  { %365 = dma.done.wait [#allocation3], 128  }
  0x35   :  { %366 = vsyncadd [#allocation3], 4294967168 }
  0x36   :  { %367 = dma.done.wait [#allocation6], 1552  }
  0x37   :  { %368 = vsyncadd [#allocation6], 4294965744  ;;  %vm57_vm0 = vcmask 261120   ;;  %v376_v0 = vmov 0   ;;  %v377_v1 = vmov 0.0   ;;  %v263_v2 = vld [vmem:[#allocation5] sm:$0xff]  }
  0x38   :  { %167 = vmatprep.subr.bf16.mxu0 %v376_v0  ;;  %58 = vst.msk [vmem:[#allocation8] sm:$0xff] %vm57_vm0, %v377_v1  ;;  %v264_v3 = vld [vmem:[#allocation5 + $0x8] sm:$0xff]   ;;  %v265_v4 = vld [vmem:[#allocation5 + $0x10] sm:$0xff]   ;;  %v266_v5 = vld [vmem:[#allocation5 + $0x18] sm:$0xff]   ;;  %vm163_vm1 = vcmask 523264   ;;  %s378_s2 = smov [#allocation8]  }
  0x39   :  { %168 = vmatpush1.bf16.msra.mxu0 %v263_v2  ;;  %v60_v6 = vld [vmem:[#allocation2] sm:$0xff]  ;;  %v267_v8 = vld [vmem:[#allocation5 + $0x20] sm:$0xff]   ;;  %v268_v9 = vld [vmem:[#allocation5 + $0x28] sm:$0xff]   ;;  %s229_s22 = sshll.u32 %s378_s2, 4  ;;  %s230_s22 = int_to_ptr.vmem [resolvable:$true] %s229_s22 }
  0x3a   :  { %169 = vmatprep.subr.bf16.mxu0 %v376_v0  ;;  %v240_v7 = vcombine.high %v60_v6, %v60_v6  ;;  %v269_v10 = vld [vmem:[#allocation5 + $0x30] sm:$0xff]   ;;  %v270_v11 = vld [vmem:[#allocation5 + $0x38] sm:$0xff]   ;;  %v271_v12 = vld [vmem:[#allocation5 + $0x40] sm:$0xff]   ;;  %v239_v16 = vcombine.low %v60_v6, %v60_v6  ;;  %s343_s23 = scalar_lea.vmem %s230_s22, 128  ;;  %p348_p11 = scmp.lt.s32.totalorder %s230_s22, %s230_s22 }
  0x3b   :  { %v272_v13 = vld [vmem:[#allocation5 + $0x48] sm:$0xff]   ;;  %v273_v14 = vld [vmem:[#allocation5 + $0x50] sm:$0xff]   ;;  %v274_v15 = vld [vmem:[#allocation5 + $0x58] sm:$0xff]   ;;  %p344_p10 = scmp.ne.s32.totalorder %s230_s22, %s343_s23  ;;  %p349_p12 = scmp.lt.s32.totalorder %s343_s23, %s343_s23 }
  0x3c   :  { %253 = vmatprep.mubr.msk.bf16.mxu0 %vm163_vm1, %v240_v7  ;;  %v254_v23 = vld [vmem:[#allocation7] ss:$0 sm:$0xff] }
  0x3d   :  { %170 = vmatpush1.bf16.msra.mxu0 %v264_v3  ;;  %p350_p13 = por %p349_p12, %p348_p11 }
  0x3e   :  { %171 = vmatprep.subr.bf16.mxu0 %v376_v0 }
  0x3f   :  { %v59_v17 = vld [vmem:[#allocation8] sm:$0xff]  ;;  %p351_p0 = pnand %p350_p13, %p344_p10 }
  0x41   :  { %172 = vmatpush1.bf16.msra.mxu0 %v265_v4 }
  0x42   :  { %173 = vmatprep.subr.bf16.mxu0 %v376_v0 }
  0x45   :  { %174 = vmatpush1.bf16.msra.mxu0 %v266_v5 }
  0x46   :  { %175 = vmatprep.subr.bf16.mxu0 %v376_v0 }
  0x49   :  { %176 = vmatpush1.bf16.msra.mxu0 %v267_v8 }
  0x4a   :  { %177 = vmatprep.subr.bf16.mxu0 %v376_v0 }
  0x4d   :  { %178 = vmatpush1.bf16.msra.mxu0 %v268_v9 }
  0x4e   :  { %179 = vmatprep.subr.bf16.mxu0 %v376_v0 }
  0x51   :  { %180 = vmatpush1.bf16.msra.mxu0 %v269_v10 }
  0x52   :  { %181 = vmatprep.subr.bf16.mxu0 %v376_v0 }
  0x55   :  { %182 = vmatpush1.bf16.msra.mxu0 %v270_v11 }
  0x56   :  { %183 = vmatprep.subr.bf16.mxu0 %v376_v0 }
  0x59   :  { %184 = vmatpush1.bf16.msra.mxu0 %v271_v12 }
  0x5a   :  { %185 = vmatprep.subr.bf16.mxu0 %v376_v0 }
  0x5d   :  { %186 = vmatpush1.bf16.msra.mxu0 %v272_v13 }
  0x5e   :  { %187 = vmatprep.subr.bf16.mxu0 %v376_v0 }
  0x61   :  { %188 = vmatpush1.bf16.msra.mxu0 %v273_v14 }
  0x62   :  { %189 = vmatprep.subr.bf16.mxu0 %v376_v0 }
  0x65   :  { %190 = vmatpush1.bf16.msra.mxu0 %v274_v15 }
  0x68   :  { %200 = vmatmul.mubr.bf16.vlgmr.msra.gmra.mrb[0].mxu0 %v239_v16 }
 0x13b   :  { %v201_v18 = vpop.f32.mrb[0].mxu0 }
 0x13c   :  { %v207_v19 = vadd.f32 %v201_v18, %v59_v17  ;;  %v203_v20 = vpop.f32.mrb[1].mxu0 }
 0x13d   :  { %v204_v21 = vpop.f32.mrb[2].mxu0 }
 0x13e   :  { %209 = vst.msk [vmem:[#allocation8] sm:$0xff] %vm57_vm0, %v207_v19  ;;  %v205_v22 = vpop.f32.mrb[3].mxu0 }
 0x145   :  { %v213_v24 = vld [vmem:[#allocation8] sm:$0xff] }
 0x146   :  { %v221_v25 = vadd.f32 %v254_v23, %v213_v24 }
 0x148   :  { %222 = vst.msk [vmem:[#allocation8] sm:$0xff] %vm57_vm0, %v221_v25 }
 0x149   :  { %354 = shalt.err (!%p351_p0)
}
 0x14a   :  { %s355_s26 = scalar_lea.hbm %s453_s3, 128 }
 0x14b   :  { %p356_p1 = scmp.ne.s32.totalorder %s453_s3, %s355_s26  ;;  %p359_p2 = scmp.lt.u32.totalorder %s355_s26, %s453_s3 }
 0x14d   :  { %p361_p3 = pnand %p359_p2, %p356_p1 }
 0x14f   :  { %364 = shalt.err (!%p361_p3)
}
 0x150   :  { %232 = dma.vmem_to_hbm [thread:$0]  %s230_s22, 128, %s453_s3, [#allocation4]  }
 0x151   :  { %369 = dma.done.wait [#allocation4], 128  }
 0x152   :  { %370 = vsyncadd [#allocation4], 4294967168 }
 0x153   :  { %236 = vsyncpa [#allocation3], 1 }
 0x154   :  { %237 = vsyncpa [#allocation6], 1 }
 0x155   :  { %238 = vsyncpa [#allocation4], 1 }

</bundles_post_ra>
